<compile_context>
chip_gen: v5e
topology: v5e:2x2
jax: 0.10.0
libtpu: 0.0.40
codegen_flags: <defaults>
</compile_context>

<pallas_src>
import functools

import jax
import jax.numpy as jnp
from jax.experimental import pallas as pl
from jax.experimental.pallas import tpu as pltpu


def _round_up(n, m):
    return ((n + m - 1) // m) * m


def _pad2d(a, rows, cols):
    return jnp.pad(a, ((0, rows - a.shape[0]), (0, cols - a.shape[1])))


def _mhd_mlp_kernel(nseg1, nseg2, h1p, h2p,
                    x_ref, ctx_ref,
                    w1_ref, b1_ref, w2_ref, b2_ref,
                    s_ref, wo_ref, bo_ref,
                    out_ref):
    x = x_ref[...]
    ctx = ctx_ref[...]

    # --- All dendritic segments of BOTH layers in one lane-dense MXU push. ---
    # s_ref: (dim_context, nseg1*h1p + nseg2*h2p); columns grouped (layer, segment).
    # context is independent of h1, so this can run before layer 1's linear.
    d_all = jnp.dot(ctx, s_ref[...], preferred_element_type=jnp.float32)

    def absmax_gate(d_layer, nseg, hp):
        # Keep the signed activation whose |value| is maximal across segments.
        # Strict '>' keeps the first (lowest-index) segment on ties, matching
        # argmax semantics. abs(d) is computed once per segment (VPU work).
        best = d_layer[:, :hp]
        best_abs = jnp.abs(best)
        for s in range(1, nseg):
            d = d_layer[:, s * hp:(s + 1) * hp]     # static, 128-aligned lane slice
            a = jnp.abs(d)
            take = a > best_abs
            best = jnp.where(take, d, best)
            best_abs = jnp.where(take, a, best_abs)
        return jax.nn.sigmoid(best)                  # EUP

    gate1 = absmax_gate(d_all[:, :nseg1 * h1p], nseg1, h1p)
    gate2 = absmax_gate(d_all[:, nseg1 * h1p:], nseg2, h2p)

    # --- Layer 1: sparse Linear + abs-max gating + ReLU. ---
    y1 = jnp.dot(x, w1_ref[...], preferred_element_type=jnp.float32) + b1_ref[...]
    h1 = jnp.maximum(y1 * gate1, 0.0)

    # --- Layer 2. ---
    y2 = jnp.dot(h1, w2_ref[...], preferred_element_type=jnp.float32) + b2_ref[...]
    h2 = jnp.maximum(y2 * gate2, 0.0)

    # --- Fused output heads: one lane-dense matmul, one unmasked store. ---
    out = jnp.dot(h2, wo_ref[...], preferred_element_type=jnp.float32) + bo_ref[...]
    out_ref[...] = out.astype(out_ref.dtype)


def multiheaded_dendritic_mlp(x, context, layers, heads, num_segments,
                              block_batch=128):
    """layers: [(W(in,h), b(1,h), S(nseg,ctx,h)), ...]; heads: [(Wo(h,do), bo(1,do)), ...]"""
    (w1, b1, s1), (w2, b2, s2) = layers
    head_ws = [wo for (wo, _) in heads]
    head_bs = [bo for (_, bo) in heads]
    out_dims = [wo.shape[1] for wo in head_ws]

    B, in_dim = x.shape
    ctx_dim = context.shape[1]
    h1, h2 = w1.shape[1], w2.shape[1]
    nseg1, nseg2 = num_segments

    # Lane-pad every feature dimension to a multiple of 128 so each vreg is
    # fully occupied and the output store is unmasked. Padding is exact (zeros
    # stay zeros through the gated ReLU), outputs are sliced back afterwards.
    h1p = _round_up(h1, 128)
    h2p = _round_up(h2, 128)
    dop = _round_up(sum(out_dims), 128)

    w1p = _pad2d(w1, in_dim, h1p)
    b1p = _pad2d(b1, 1, h1p)
    w2p = _pad2d(w2, h1p, h2p)
    b2p = _pad2d(b2, 1, h2p)

    # Segment weights: (nseg, ctx, h) -> (ctx, nseg*hp); both layers are
    # concatenated along the lane axis so ONE matmul yields every segment
    # activation for both layers.
    def pack_segments(s, hp):
        nseg = s.shape[0]
        sp = jnp.pad(s, ((0, 0), (0, 0), (0, hp - s.shape[2])))
        return jnp.transpose(sp, (1, 0, 2)).reshape(ctx_dim, nseg * hp)

    s_cat = jnp.concatenate([pack_segments(s1, h1p), pack_segments(s2, h2p)], axis=1)

    # Fused output heads: single (h2p, dop) matrix; split per head outside.
    wo_cat = _pad2d(jnp.concatenate(head_ws, axis=1), h2p, dop)
    bo_cat = _pad2d(jnp.concatenate(head_bs, axis=1), 1, dop)

    # Batch tiling: parallel grid axis -> BlockSpec pipelining of x/ctx/out and
    # megacore sharding on v7x. Weights stay whole-array resident in VMEM.
    tb = min(block_batch, _round_up(B, 8))
    bp = _round_up(B, tb)
    xp = jnp.pad(x, ((0, bp - B), (0, 0)))
    cp = jnp.pad(context, ((0, bp - B), (0, 0)))
    grid = (bp // tb,)

    kernel = functools.partial(_mhd_mlp_kernel, nseg1, nseg2, h1p, h2p)

    def batch_map(i):
        return (i, 0)

    def const_map(i):
        return (0, 0)

    in_specs = [
        pl.BlockSpec((tb, in_dim), batch_map),      # x            (batch-tiled)
        pl.BlockSpec((tb, ctx_dim), batch_map),     # context      (batch-tiled)
        pl.BlockSpec(w1p.shape, const_map),         # W1           (resident)
        pl.BlockSpec(b1p.shape, const_map),         # b1
        pl.BlockSpec(w2p.shape, const_map),         # W2
        pl.BlockSpec(b2p.shape, const_map),         # b2
        pl.BlockSpec(s_cat.shape, const_map),       # all segments, both layers
        pl.BlockSpec(wo_cat.shape, const_map),      # fused head weights
        pl.BlockSpec(bo_cat.shape, const_map),      # fused head biases
    ]

    out_fused = pl.pallas_call(
        kernel,
        out_shape=jax.ShapeDtypeStruct((bp, dop), jnp.float32),
        grid=grid,
        in_specs=in_specs,
        out_specs=pl.BlockSpec((tb, dop), batch_map),
        compiler_params=pltpu.CompilerParams(
            dimension_semantics=("parallel",)),
    )(xp, cp, w1p, b1p, w2p, b2p, s_cat, wo_cat, bo_cat)

    # Split the fused, padded head output back into per-head tensors.
    outs = []
    off = 0
    for d in out_dims:
        outs.append(out_fused[:B, off:off + d])
        off += d
    return outs


def init_params(key, input_size, dim_context, hidden_sizes, num_segments,
                output_dims, sparsity=0.5):
    """Deterministic synthetic parameters. module_sparsity / dendrite_sparsity
    are init-time weight masks (SparseWeights); forward is a dense matmul on the
    masked weights, so the masks are baked into the weights here."""
    keys = iter(jax.random.split(key, 64))
    layers = []
    prev = input_size
    for h, nseg in zip(hidden_sizes, num_segments):
        w = jax.random.normal(next(keys), (prev, h), jnp.float32) / jnp.sqrt(prev)
        w = w * (jax.random.uniform(next(keys), (prev, h)) >= sparsity)              # module sparsity
        b = 0.01 * jax.random.normal(next(keys), (1, h), jnp.float32)
        s = jax.random.normal(next(keys), (nseg, dim_context, h), jnp.float32) / jnp.sqrt(dim_context)
        s = s * (jax.random.uniform(next(keys), (nseg, dim_context, h)) >= sparsity)  # dendrite sparsity
        layers.append((w, b, s))
        prev = h
    heads = []
    for d in output_dims:
        wo = jax.random.normal(next(keys), (prev, d), jnp.float32) / jnp.sqrt(prev)
        bo = 0.01 * jax.random.normal(next(keys), (1, d), jnp.float32)
        heads.append((wo, bo))
    return layers, heads


def reference_forward(x, context, layers, heads):
    """Pure-JAX reference mirroring the PyTorch module."""
    h = x
    for (w, b, seg) in layers:
        y = h @ w + b
        d = jnp.einsum('bc,sch->bhs', context, seg)          # (B, H, nseg)
        idx = jnp.argmax(jnp.abs(d), axis=-1)
        sel = jnp.take_along_axis(d, idx[..., None], axis=-1)[..., 0]
        h = jax.nn.relu(y * jax.nn.sigmoid(sel))
    return [h @ wo + bo for (wo, bo) in heads]


if __name__ == "__main__":
    # Small shapes consistent with the module's forward:
    #   x: (batch, input_size), context: (batch, dim_context)
    batch = 64
    input_size = 16
    dim_context = 16
    hidden_sizes = (32, 32)
    num_segments = (5, 5)
    output_dims = (10, 4)          # num_heads = 2

    key = jax.random.PRNGKey(0)
    kx, kc, kp = jax.random.split(key, 3)
    x = jax.random.normal(kx, (batch, input_size), jnp.float32)
    context = jax.random.normal(kc, (batch, dim_context), jnp.float32)

    layers, heads = init_params(kp, input_size, dim_context, hidden_sizes,
                                num_segments, output_dims)

    outs = multiheaded_dendritic_mlp(x, context, layers, heads, num_segments,
                                     block_batch=32)   # grid=(2,) to exercise tiling
    outs = jax.block_until_ready(outs)

    refs = reference_forward(x, context, layers, heads)
    for o, r in zip(outs, refs):
        assert o.shape == r.shape
        assert jnp.allclose(o, r, atol=1e-4, rtol=1e-4), (o, r)

    print("KERNEL_OK")
</pallas_src>

<mosaic_0001>
module attributes {stable_mosaic.version = 11 : i64} {
  func.func @_mhd_mlp_kernel(%arg0: i32, %arg1: memref<32x16xf32, #tpu.memory_space<vmem>>, %arg2: memref<32x16xf32, #tpu.memory_space<vmem>>, %arg3: memref<16x128xf32, #tpu.memory_space<vmem>>, %arg4: memref<1x128xf32, #tpu.memory_space<vmem>>, %arg5: memref<128x128xf32, #tpu.memory_space<vmem>>, %arg6: memref<1x128xf32, #tpu.memory_space<vmem>>, %arg7: memref<16x1280xf32, #tpu.memory_space<vmem>>, %arg8: memref<128x128xf32, #tpu.memory_space<vmem>>, %arg9: memref<1x128xf32, #tpu.memory_space<vmem>>, %arg10: memref<32x128xf32, #tpu.memory_space<vmem>>) attributes {dimension_semantics = [#tpu.dimension_semantics<parallel>], iteration_bounds = array<i64: 2>, scalar_prefetch = 0 : i64, scratch_operands = 0 : i64, tpu.core_type = #tpu.core_type<tc>, window_params = [{transform_indices = @transform_0, window_bounds = array<i64: 32, 16>}, {transform_indices = @transform_1, window_bounds = array<i64: 32, 16>}, {pipeline_mode = #tpu.pipeline_mode<synchronous>, transform_indices = @transform_2, window_bounds = array<i64: 16, 128>}, {pipeline_mode = #tpu.pipeline_mode<synchronous>, transform_indices = @transform_3, window_bounds = array<i64: 1, 128>}, {pipeline_mode = #tpu.pipeline_mode<synchronous>, transform_indices = @transform_4, window_bounds = array<i64: 128, 128>}, {pipeline_mode = #tpu.pipeline_mode<synchronous>, transform_indices = @transform_5, window_bounds = array<i64: 1, 128>}, {pipeline_mode = #tpu.pipeline_mode<synchronous>, transform_indices = @transform_6, window_bounds = array<i64: 16, 1280>}, {pipeline_mode = #tpu.pipeline_mode<synchronous>, transform_indices = @transform_7, window_bounds = array<i64: 128, 128>}, {pipeline_mode = #tpu.pipeline_mode<synchronous>, transform_indices = @transform_8, window_bounds = array<i64: 1, 128>}, {transform_indices = @transform_9, window_bounds = array<i64: 32, 128>}]} {
    %c0 = arith.constant 0 : index
    %c0_0 = arith.constant 0 : index
    %0 = vector.load %arg1[%c0, %c0_0] : memref<32x16xf32, #tpu.memory_space<vmem>>, vector<32x16xf32>
    %c0_1 = arith.constant 0 : index
    %c0_2 = arith.constant 0 : index
    %1 = vector.load %arg2[%c0_1, %c0_2] : memref<32x16xf32, #tpu.memory_space<vmem>>, vector<32x16xf32>
    %c0_3 = arith.constant 0 : index
    %c0_4 = arith.constant 0 : index
    %2 = vector.load %arg7[%c0_3, %c0_4] : memref<16x1280xf32, #tpu.memory_space<vmem>>, vector<16x1280xf32>
    %cst = arith.constant dense<0.000000e+00> : vector<32x1280xf32>
    %3 = tpu.matmul %1, %2, %cst {dimension_numbers = #tpu.dot_dimension_numbers<[1], [0], [0], [1], [0, 0, 1, 1], [], []>} : vector<32x16xf32>, vector<16x1280xf32>, vector<32x1280xf32> -> vector<32x1280xf32>
    %4 = vector.extract_strided_slice %3 {offsets = [0, 0], sizes = [32, 640], strides = [1, 1]} : vector<32x1280xf32> to vector<32x640xf32>
    %5 = vector.extract_strided_slice %4 {offsets = [0, 0], sizes = [32, 128], strides = [1, 1]} : vector<32x640xf32> to vector<32x128xf32>
    %6 = math.absf %5 : vector<32x128xf32>
    %7 = vector.extract_strided_slice %4 {offsets = [0, 128], sizes = [32, 128], strides = [1, 1]} : vector<32x640xf32> to vector<32x128xf32>
    %8 = math.absf %7 : vector<32x128xf32>
    %9 = arith.cmpf ogt, %8, %6 : vector<32x128xf32>
    %10 = arith.select %9, %7, %5 : vector<32x128xi1>, vector<32x128xf32>
    %11 = arith.select %9, %8, %6 : vector<32x128xi1>, vector<32x128xf32>
    %12 = vector.extract_strided_slice %4 {offsets = [0, 256], sizes = [32, 128], strides = [1, 1]} : vector<32x640xf32> to vector<32x128xf32>
    %13 = math.absf %12 : vector<32x128xf32>
    %14 = arith.cmpf ogt, %13, %11 : vector<32x128xf32>
    %15 = arith.select %14, %12, %10 : vector<32x128xi1>, vector<32x128xf32>
    %16 = arith.select %14, %13, %11 : vector<32x128xi1>, vector<32x128xf32>
    %17 = vector.extract_strided_slice %4 {offsets = [0, 384], sizes = [32, 128], strides = [1, 1]} : vector<32x640xf32> to vector<32x128xf32>
    %18 = math.absf %17 : vector<32x128xf32>
    %19 = arith.cmpf ogt, %18, %16 : vector<32x128xf32>
    %20 = arith.select %19, %17, %15 : vector<32x128xi1>, vector<32x128xf32>
    %21 = arith.select %19, %18, %16 : vector<32x128xi1>, vector<32x128xf32>
    %22 = vector.extract_strided_slice %4 {offsets = [0, 512], sizes = [32, 128], strides = [1, 1]} : vector<32x640xf32> to vector<32x128xf32>
    %23 = math.absf %22 : vector<32x128xf32>
    %24 = arith.cmpf ogt, %23, %21 : vector<32x128xf32>
    %25 = arith.select %24, %22, %20 : vector<32x128xi1>, vector<32x128xf32>
    %26 = arith.negf %25 : vector<32x128xf32>
    %27 = math.exp %26 : vector<32x128xf32>
    %cst_5 = arith.constant 1.000000e+00 : f32
    %28 = vector.broadcast %cst_5 : f32 to vector<32x128xf32>
    %29 = arith.addf %28, %27 : vector<32x128xf32>
    %30 = arith.divf %28, %29 : vector<32x128xf32>
    %31 = vector.extract_strided_slice %3 {offsets = [0, 640], sizes = [32, 640], strides = [1, 1]} : vector<32x1280xf32> to vector<32x640xf32>
    %32 = vector.extract_strided_slice %31 {offsets = [0, 0], sizes = [32, 128], strides = [1, 1]} : vector<32x640xf32> to vector<32x128xf32>
    %33 = math.absf %32 : vector<32x128xf32>
    %34 = vector.extract_strided_slice %31 {offsets = [0, 128], sizes = [32, 128], strides = [1, 1]} : vector<32x640xf32> to vector<32x128xf32>
    %35 = math.absf %34 : vector<32x128xf32>
    %36 = arith.cmpf ogt, %35, %33 : vector<32x128xf32>
    %37 = arith.select %36, %34, %32 : vector<32x128xi1>, vector<32x128xf32>
    %38 = arith.select %36, %35, %33 : vector<32x128xi1>, vector<32x128xf32>
    %39 = vector.extract_strided_slice %31 {offsets = [0, 256], sizes = [32, 128], strides = [1, 1]} : vector<32x640xf32> to vector<32x128xf32>
    %40 = math.absf %39 : vector<32x128xf32>
    %41 = arith.cmpf ogt, %40, %38 : vector<32x128xf32>
    %42 = arith.select %41, %39, %37 : vector<32x128xi1>, vector<32x128xf32>
    %43 = arith.select %41, %40, %38 : vector<32x128xi1>, vector<32x128xf32>
    %44 = vector.extract_strided_slice %31 {offsets = [0, 384], sizes = [32, 128], strides = [1, 1]} : vector<32x640xf32> to vector<32x128xf32>
    %45 = math.absf %44 : vector<32x128xf32>
    %46 = arith.cmpf ogt, %45, %43 : vector<32x128xf32>
    %47 = arith.select %46, %44, %42 : vector<32x128xi1>, vector<32x128xf32>
    %48 = arith.select %46, %45, %43 : vector<32x128xi1>, vector<32x128xf32>
    %49 = vector.extract_strided_slice %31 {offsets = [0, 512], sizes = [32, 128], strides = [1, 1]} : vector<32x640xf32> to vector<32x128xf32>
    %50 = math.absf %49 : vector<32x128xf32>
    %51 = arith.cmpf ogt, %50, %48 : vector<32x128xf32>
    %52 = arith.select %51, %49, %47 : vector<32x128xi1>, vector<32x128xf32>
    %53 = arith.negf %52 : vector<32x128xf32>
    %54 = math.exp %53 : vector<32x128xf32>
    %cst_6 = arith.constant 1.000000e+00 : f32
    %55 = vector.broadcast %cst_6 : f32 to vector<32x128xf32>
    %56 = arith.addf %55, %54 : vector<32x128xf32>
    %57 = arith.divf %55, %56 : vector<32x128xf32>
    %c0_7 = arith.constant 0 : index
    %c0_8 = arith.constant 0 : index
    %58 = vector.load %arg3[%c0_7, %c0_8] : memref<16x128xf32, #tpu.memory_space<vmem>>, vector<16x128xf32>
    %cst_9 = arith.constant dense<0.000000e+00> : vector<32x128xf32>
    %59 = tpu.matmul %0, %58, %cst_9 {dimension_numbers = #tpu.dot_dimension_numbers<[1], [0], [0], [1], [0, 0, 1, 1], [], []>} : vector<32x16xf32>, vector<16x128xf32>, vector<32x128xf32> -> vector<32x128xf32>
    %c0_10 = arith.constant 0 : index
    %c0_11 = arith.constant 0 : index
    %60 = vector.load %arg4[%c0_10, %c0_11] : memref<1x128xf32, #tpu.memory_space<vmem>>, vector<1x128xf32>
    %61 = vector.broadcast %60 : vector<1x128xf32> to vector<32x128xf32>
    %62 = arith.addf %59, %61 : vector<32x128xf32>
    %63 = arith.mulf %62, %30 : vector<32x128xf32>
    %cst_12 = arith.constant 0.000000e+00 : f32
    %64 = vector.broadcast %cst_12 : f32 to vector<32x128xf32>
    %65 = arith.maximumf %63, %64 : vector<32x128xf32>
    %c0_13 = arith.constant 0 : index
    %c0_14 = arith.constant 0 : index
    %66 = vector.load %arg5[%c0_13, %c0_14] : memref<128x128xf32, #tpu.memory_space<vmem>>, vector<128x128xf32>
    %cst_15 = arith.constant dense<0.000000e+00> : vector<32x128xf32>
    %67 = tpu.matmul %65, %66, %cst_15 {dimension_numbers = #tpu.dot_dimension_numbers<[1], [0], [0], [1], [0, 0, 1, 1], [], []>} : vector<32x128xf32>, vector<128x128xf32>, vector<32x128xf32> -> vector<32x128xf32>
    %c0_16 = arith.constant 0 : index
    %c0_17 = arith.constant 0 : index
    %68 = vector.load %arg6[%c0_16, %c0_17] : memref<1x128xf32, #tpu.memory_space<vmem>>, vector<1x128xf32>
    %69 = vector.broadcast %68 : vector<1x128xf32> to vector<32x128xf32>
    %70 = arith.addf %67, %69 : vector<32x128xf32>
    %71 = arith.mulf %70, %57 : vector<32x128xf32>
    %cst_18 = arith.constant 0.000000e+00 : f32
    %72 = vector.broadcast %cst_18 : f32 to vector<32x128xf32>
    %73 = arith.maximumf %71, %72 : vector<32x128xf32>
    %c0_19 = arith.constant 0 : index
    %c0_20 = arith.constant 0 : index
    %74 = vector.load %arg8[%c0_19, %c0_20] : memref<128x128xf32, #tpu.memory_space<vmem>>, vector<128x128xf32>
    %cst_21 = arith.constant dense<0.000000e+00> : vector<32x128xf32>
    %75 = tpu.matmul %73, %74, %cst_21 {dimension_numbers = #tpu.dot_dimension_numbers<[1], [0], [0], [1], [0, 0, 1, 1], [], []>} : vector<32x128xf32>, vector<128x128xf32>, vector<32x128xf32> -> vector<32x128xf32>
    %c0_22 = arith.constant 0 : index
    %c0_23 = arith.constant 0 : index
    %76 = vector.load %arg9[%c0_22, %c0_23] : memref<1x128xf32, #tpu.memory_space<vmem>>, vector<1x128xf32>
    %77 = vector.broadcast %76 : vector<1x128xf32> to vector<32x128xf32>
    %78 = arith.addf %75, %77 : vector<32x128xf32>
    %c0_24 = arith.constant 0 : index
    %c0_25 = arith.constant 0 : index
    %79 = vector.load %arg10[%c0_24, %c0_25] : memref<32x128xf32, #tpu.memory_space<vmem>>, vector<32x128xf32>
    tpu.vector_store %arg10[%c0_24, %c0_25], %78 {strides = array<i32>} : memref<32x128xf32, #tpu.memory_space<vmem>>, vector<32x128xf32>,
    return
  }
  func.func @transform_0(%arg0: i32) -> (i32, i32) {
    %c0_i32 = arith.constant 0 : i32
    %c0_i32_0 = arith.constant 0 : i32
    return %arg0, %c0_i32 : i32, i32
  }
  func.func @transform_1(%arg0: i32) -> (i32, i32) {
    %c0_i32 = arith.constant 0 : i32
    %c0_i32_0 = arith.constant 0 : i32
    return %arg0, %c0_i32 : i32, i32
  }
  func.func @transform_2(%arg0: i32) -> (i32, i32) {
    %c0_i32 = arith.constant 0 : i32
    %c0_i32_0 = arith.constant 0 : i32
    %c0_i32_1 = arith.constant 0 : i32
    return %c0_i32, %c0_i32_0 : i32, i32
  }
  func.func @transform_3(%arg0: i32) -> (i32, i32) {
    %c0_i32 = arith.constant 0 : i32
    %c0_i32_0 = arith.constant 0 : i32
    %c0_i32_1 = arith.constant 0 : i32
    return %c0_i32, %c0_i32_0 : i32, i32
  }
  func.func @transform_4(%arg0: i32) -> (i32, i32) {
    %c0_i32 = arith.constant 0 : i32
    %c0_i32_0 = arith.constant 0 : i32
    %c0_i32_1 = arith.constant 0 : i32
    return %c0_i32, %c0_i32_0 : i32, i32
  }
  func.func @transform_5(%arg0: i32) -> (i32, i32) {
    %c0_i32 = arith.constant 0 : i32
    %c0_i32_0 = arith.constant 0 : i32
    %c0_i32_1 = arith.constant 0 : i32
    return %c0_i32, %c0_i32_0 : i32, i32
  }
  func.func @transform_6(%arg0: i32) -> (i32, i32) {
    %c0_i32 = arith.constant 0 : i32
    %c0_i32_0 = arith.constant 0 : i32
    %c0_i32_1 = arith.constant 0 : i32
    return %c0_i32, %c0_i32_0 : i32, i32
  }
  func.func @transform_7(%arg0: i32) -> (i32, i32) {
    %c0_i32 = arith.constant 0 : i32
    %c0_i32_0 = arith.constant 0 : i32
    %c0_i32_1 = arith.constant 0 : i32
    return %c0_i32, %c0_i32_0 : i32, i32
  }
  func.func @transform_8(%arg0: i32) -> (i32, i32) {
    %c0_i32 = arith.constant 0 : i32
    %c0_i32_0 = arith.constant 0 : i32
    %c0_i32_1 = arith.constant 0 : i32
    return %c0_i32, %c0_i32_0 : i32, i32
  }
  func.func @transform_9(%arg0: i32) -> (i32, i32) {
    %c0_i32 = arith.constant 0 : i32
    %c0_i32_0 = arith.constant 0 : i32
    return %arg0, %c0_i32 : i32, i32
  }
}

</mosaic_0001>

<bundles_post_ra>
// kernel: tpu_custom_call.1
= control target key start
LH: loop header
LB: loop body
LE: loop exit
PB: predicated region body
PF: predicated region fallthrough
CT: control target
= control target key end

     0   :  { %s2179_s0 = inlined_call_operand.vmem [shape: f32[64,16], index: 0, kind: input, shape index: {}]   ;;  %s2180_s1 = inlined_call_operand.vmem [shape: f32[64,16], index: 1, kind: input, shape index: {}]   ;;  %s2181_s2 = inlined_call_operand.vmem [shape: f32[16,128], index: 2, kind: input, shape index: {}]   ;;  %s2182_s3 = inlined_call_operand.vmem [shape: f32[1,128], index: 3, kind: input, shape index: {}]   ;;  %s2183_s4 = inlined_call_operand.vmem [shape: f32[128,128], index: 4, kind: input, shape index: {}]   ;;  %s2184_s5 = inlined_call_operand.vmem [shape: f32[1,128], index: 5, kind: input, shape index: {}]   ;;  %s2185_s6 = inlined_call_operand.hbm [shape: f32[16,1280], index: 6, kind: input, shape index: {}]   ;;  %s2186_s7 = inlined_call_operand.hbm [shape: f32[128,128], index: 7, kind: input, shape index: {}]   ;;  %s2187_s8 = inlined_call_operand.vmem [shape: f32[1,128], index: 8, kind: input, shape index: {}]   ;;  %s2188_s9 = inlined_call_operand.hbm [shape: f32[64,128], index: 9, kind: output, shape index: {}]  }
   0x1   :  { %2189 = sst [smem:[#allocation11_spill]] %s2185_s6 }
   0x2   :  { %14 = vsyncpa [#allocation3], 0 }
   0x3   :  { %15 = vsyncpa [#allocation6], 0 }
   0x4   :  { %16 = vsyncpa [#allocation4], 0 }
   0x5   :  { %18 = vsyncpa [#allocation4 + $0x1], 0  ;;  %s1646_s30 = smov 0   ;;  %s1648_s10 = smov 0  }
   0x6   :  { %s1650_s11 = smov 0   ;;  %s1652_s12 = smov 0  }
   0x7 LB: > { %s1667_s13 = sadd.s32 4294967295, %s1586_s12   ;;  %s1278_s14 = sadd.s32 4294967294, %s1586_s12   ;;  %s1586_s12 = sphi %s1652_s12, %s2243_s12   ;;  %s1582_s11 = sphi %s1650_s11, %s2242_s11   ;;  %s1578_s10 = sphi %s1648_s10, %s2241_s10   ;;  %s1574_s30 = sphi %s1646_s30, %s2240_s30  }
   0x8   : > { %s1671_s15 = sadd.s32 1, %s1586_s12   ;;  %s230_s16 = sadd.s32 1, %s1582_s11 }
   0x9   : > { %s227_s17 = ssub.s32 %s1586_s12, %s1671_s15  ;;  %p240_p0 = scmp.ne.s32.totalorder %s1582_s11, %s1578_s10 }
   0xa   : > { %p228_p1 = scmp.eq.s32.totalorder %s227_s17, 0  ;;  %p241_p2 = scmp.eq.s32.totalorder %s1667_s13, 1 }
   0xb   : > { %p246_p3 = scmp.ne.s32.totalorder %s1578_s10, %s1574_s30  ;;  %p247_p4 = scmp.eq.s32.totalorder %s1278_s14, 1 }
   0xc   : > { %s1682_s18 = scalar_select %p228_p1, %s1582_s11, %s230_s16  }
   0xd   : > { %p1684_p5 = por %p241_p2, %p240_p0  ;;  %p1688_p6 = por %p247_p4, %p246_p3 }
   0xe   : > { %p1279_p7 = scmp.ge.s32.totalorder %s1586_s12, 1  ;;  %p254_p8 = scmp.lt.s32.totalorder %s1586_s12, 3 }
   0xf   : > { %p1376_p9 = scmp.eq.s32.totalorder %s1667_s13, 0  ;;  %s2193_s6 = sld [smem:[#allocation11_spill]] }
  0x10   : > { %p1695_p10 = pnand %p1279_p7, %p254_p8  ;;  %s1588_s25 = smov [#allocation2]  }
  0x11   : > { %s279_s26 = sshll.u32 %s1588_s25, 4  ;;  %s291_s29 = sshll.u32 %s2186_s7, 4  ;;  %s280_s26 = int_to_ptr.vmem [resolvable:$true] %s279_s26  ;;  %s292_s29 = int_to_ptr.hbm [resolvable:$true] %s291_s29 }
  0x12   : > { %p1365_p11 = pneg %p1695_p10  ;;  %s1589_s14 = smov 1280  }
  0x13   : > { %s1590_s16 = smov 80   ;;  %s1591_s17 = smov [#allocation5]  }
  0x14   : > { %p1366_p12 = pnand %p1376_p9, %p1365_p11  ;;  %s293_s22 = sshll.u32 %s1591_s17, 4  ;;  %s294_s22 = int_to_ptr.vmem [resolvable:$true] %s293_s22 }
  0x15   : > { %s277_s24 = sshll.u32 %s2193_s6, 4  ;;  %s1592_s23 = smov 128   ;;  %s278_s24 = int_to_ptr.hbm [resolvable:$true] %s277_s24 }
  0x16   : > { %1368 = dma.hbm_to_vmem [thread:$0]  (!%p1366_p12), %s278_s24, 2560, %s280_s26, [#allocation3], %s1589_s14, %s1589_s14, %s1590_s16  }
  0x17   : > { %s1593_s6 = smov 8   ;;  %330 = sbr.rel (%p1695_p10) target bundleno = 542 (0x21e), region = 56 }
  0x18   : > { %1371 = dma.hbm_to_vmem [thread:$0]  (!%p1366_p12), %s292_s29, 2048, %s294_s22, [#allocation6], %s1592_s23, %s1592_s23, %s1593_s6  }
  0x1c   : > { %1561 = dma.done.wait (%p1376_p9), [#allocation3], 2560  }
  0x1d   : > { %1563 = vsyncadd (%p1376_p9), [#allocation3], 4294964736 }
  0x1e   : > { %1565 = dma.done.wait (%p1376_p9), [#allocation6], 2048  }
  0x1f   : > { %1567 = vsyncadd (%p1376_p9), [#allocation6], 4294965248  ;;  %s1287_s24 = sshll.u32 %s1667_s13, 2  ;;  %v408_v0 = vld [vmem:[#allocation2 + $0x50] sm:$0xff]  ;;  %v398_v1 = vld [vmem:[#allocation2] sm:$0xff]  ;;  %vm418_vm0 = vcmask 130048  }
  0x20   : > { %p378_p13 = scmp.lt.s32.totalorder %s1287_s24, 7  ;;  %1349 = vmatpush.msra.mxu1 %v408_v0  ;;  %1350 = vmatpush.msra.mxu2 %v408_v0  ;;  %v410_v4 = vld [vmem:[#allocation2 + $0x60] sm:$0xff]  ;;  %v409_v6 = vld [vmem:[#allocation2 + $0x58] sm:$0xff]  ;;  %v400_v7 = vld [vmem:[#allocation2 + $0x10] sm:$0xff]  ;;  %s374_s16 = sand.u32 1, %s1578_s10  }
  0x21   : > { %1351 = vmatpush.msra.mxu3 %v408_v0  ;;  %445 = vmatpush.msra.mxu0 %v408_v0  ;;  %v399_v8 = vld [vmem:[#allocation2 + $0x8] sm:$0xff]  ;;  %v414_v10 = vld [vmem:[#allocation2 + $0x80] sm:$0xff]  ;;  %v401_v11 = vld [vmem:[#allocation2 + $0x18] sm:$0xff]  ;;  %s1286_s17 = sshll.u32 %s374_s16, 5  ;;  %s1167_s29 = scalar_lea.sflag [#allocation4], %s374_s16 }
  0x22   : > { %s2245_s24 = smov (!%p378_p13, %s1287_s24), 7  ;;  %1352 = vmatpush.msra.mxu1 %v398_v1  ;;  %1353 = vmatpush.msra.mxu2 %v398_v1  ;;  %v411_v9 = vld [vmem:[#allocation2 + $0x68] sm:$0xff]  ;;  %v404_v12 = vld [vmem:[#allocation2 + $0x30] sm:$0xff]  ;;  %v413_v14 = vld [vmem:[#allocation2 + $0x78] sm:$0xff]  ;;  %s1536_s23 = scalar_lea.hbm %s2188_s9, 64 }
  0x23   : > { %s1288_s6 = sshll.u32 %s2245_s24, 3  ;;  %1354 = vmatpush.msra.mxu3 %v398_v1  ;;  %v412_v13 = vld [vmem:[#allocation2 + $0x70] sm:$0xff]  ;;  %446 = vmatpush.msra.mxu0 %v398_v1  ;;  %v402_v16 = vld [vmem:[#allocation2 + $0x20] sm:$0xff]  ;;  %v403_v17 = vld [vmem:[#allocation2 + $0x28] sm:$0xff]  ;;  %s376_s24 = scalar_lea.vmem [#allocation7], %s1286_s17 }
  0x24   : > { %s1728_s26 = scalar_lea.vmem %s2180_s1, %s1288_s6  ;;  %503 = vmatpush.msrb.mxu2 %v410_v4  ;;  %474 = vmatpush.msrb.mxu1 %v409_v6  ;;  %v415_v18 = vld [vmem:[#allocation2 + $0x88] sm:$0xff]  ;;  %v405_v20 = vld [vmem:[#allocation2 + $0x38] sm:$0xff]  ;;  %v416_v21 = vld [vmem:[#allocation2 + $0x90] sm:$0xff]  ;;  %s381_s22 = scalar_lea.vmem %s2179_s0, %s1288_s6 }
  0x25   : > { %v1731_v2 = vld [vmem:[%s1728_s26 + $0x8] sm:$0xff]  ;;  %v1734_v3 = vld [vmem:[%s1728_s26 + $0x10] sm:$0xff]  ;;  %v1737_v5 = vld [vmem:[%s1728_s26 + $0x18] sm:$0xff]  ;;  %532 = vmatpush.msrb.mxu3 %v411_v9  ;;  %561 = vmatpush.msrb.mxu0 %v412_v13  ;;  %s1348_s6 = sshll.u32 %s1667_s13, 5  ;;  %s1179_s27 = sshll.u32 %s376_s24, 4  ;;  %s1180_s27 = int_to_ptr.vmem [resolvable:$true] %s1179_s27 }
  0x26   : > { %1292 = vmatmul.msk.f32.vlgmr.msra.gmra.mxu1 %vm418_vm0, %v1731_v2  ;;  %1293 = vmatmul.msk.f32.vlgmr.msra.gmra.mxu2 %vm418_vm0, %v1734_v3  ;;  %v394_v15 = vld [vmem:[%s1728_s26] sm:$0xff]  ;;  %v1002_v19 = vld [vmem:[%s2181_s2 + $0x8] sm:$0xff]  ;;  %v417_v24 = vld [vmem:[#allocation2 + $0x98] sm:$0xff]  ;;  %s1178_s26 = scalar_lea.hbm %s2188_s9, %s1348_s6 }
  0x27   : > { %1294 = vmatmul.msk.f32.vlgmr.msra.gmra.mxu3 %vm418_vm0, %v1737_v5  ;;  %504 = vmatpush.msrb.mxu2 %v400_v7  ;;  %v406_v22 = vld [vmem:[#allocation2 + $0x40] sm:$0xff]  ;;  %v407_v25 = vld [vmem:[#allocation2 + $0x48] sm:$0xff]  ;;  %v392_v28 = vld [vmem:[%s381_s22 + $0x10] sm:$0xff]  ;;  %s1181_s28 = sshll.u32 %s1178_s26, 4  ;;  %s1182_s28 = int_to_ptr.hbm [resolvable:$true] %s1181_s28 }
  0x28   : > { %475 = vmatpush.msrb.mxu1 %v399_v8  ;;  %533 = vmatpush.msrb.mxu3 %v401_v11  ;;  %v1001_v23 = vld [vmem:[%s2181_s2] sm:$0xff]  ;;  %v391_v27 = vld [vmem:[%s381_s22 + $0x8] sm:$0xff]  ;;  %v393_v29 = vld [vmem:[%s381_s22 + $0x18] sm:$0xff]  ;;  %s1530_s14 = sshra.s32 %s1182_s28, 4  ;;  %s1531_s14 = int_to_ptr.hbm [resolvable:$true] %s1530_s14 }
  0x29   : > { %619 = vmatpush.msra.mxu2 %v414_v10  ;;  %1291 = vmatmul.msk.f32.vlgmr.msra.gmra.mxu0 %vm418_vm0, %v394_v15  ;;  %v390_v26 = vld [vmem:[%s381_s22] sm:$0xff]  ;;  %v1071_v50 = vld [vmem:[%s2183_s4 + $0x78] sm:$0xff]  ;;  %v1070_v58 = vld [vmem:[%s2183_s4 + $0x70] sm:$0xff]  ;;  %s1532_s17 = scalar_lea.hbm %s1531_s14, 32  ;;  %p1537_p3 = scmp.lt.s32.totalorder %s1531_s14, %s2188_s9 }
  0x2a   : > { %590 = vmatpush.msra.mxu1 %v413_v14  ;;  %562 = vmatpush.msrb.mxu0 %v402_v16  ;;  %v1069_v62 = vld [vmem:[%s2183_s4 + $0x68] sm:$0xff]  ;;  %v1068_v4 = vld [vmem:[%s2183_s4 + $0x60] sm:$0xff]  ;;  %v1067_v8 = vld [vmem:[%s2183_s4 + $0x58] sm:$0xff]  ;;  %p1533_p0 = scmp.ne.s32.totalorder %s1531_s14, %s1532_s17  ;;  %p1538_p4 = scmp.lt.s32.totalorder %s1536_s23, %s1532_s17 }
  0x2b   : > { %620 = vmatpush.msra.mxu2 %v404_v12  ;;  %648 = vmatpush.msra.mxu3 %v415_v18  ;;  %v1066_v18 = vld [vmem:[%s2183_s4 + $0x50] sm:$0xff]  ;;  %v1061_v45 = vld [vmem:[%s2183_s4 + $0x28] sm:$0xff] }
  0x2c   : > { %591 = vmatpush.msra.mxu1 %v403_v17  ;;  %677 = vmatpush.msra.mxu0 %v416_v21  ;;  %p1534_p1 = pnand %p1533_p0, %p1684_p5  ;;  %p1539_p7 = por %p1538_p4, %p1537_p3 }
  0x2d   : > { %649 = vmatpush.msra.mxu3 %v405_v20 }
  0x2e   : > { %1295 = vmatmul.msk.f32.vlgmr.msrb.gmra.mxu1 %vm418_vm0, %v394_v15  ;;  %1299 = vmatmul.msk.f32.vlgmr.msrb.gmra.mxu2 %vm418_vm0, %v394_v15  ;;  %p1535_p2 = pneg %p1534_p1 }
  0x2f   : > { %1303 = vmatmul.msk.f32.vlgmr.msrb.gmra.mxu3 %vm418_vm0, %v394_v15  ;;  %1033 = vmatpush.msrb.mxu2 %v1002_v19 }
  0x30   : > { %678 = vmatpush.msra.mxu0 %v406_v22  ;;  %706 = vmatpush.msrb.mxu1 %v417_v24  ;;  %v1065_v22 = vld [vmem:[%s2183_s4 + $0x48] sm:$0xff]  ;;  %p1540_p8 = pnand %p1539_p7, %p1535_p2 }
  0x31   : > { %1307 = vmatmul.msk.f32.vlgmr.msrb.gmra.mxu0 %vm418_vm0, %v394_v15  ;;  %1034 = vmatpush.msrb.mxu2 %v1001_v23 }
  0x32   : > { %707 = vmatpush.msrb.mxu1 %v407_v25  ;;  %1076 = vmatpush.msrb.mxu3 %v1071_v50 }
  0x34   : > { %1077 = vmatpush.msrb.mxu3 %v1070_v58 }
  0x36   : > { %1296 = vmatmul.msk.f32.gmra.mxu1 %vm418_vm0, %v1731_v2  ;;  %1300 = vmatmul.msk.f32.gmra.mxu2 %vm418_vm0, %v1731_v2 }
  0x37   : > { %1304 = vmatmul.msk.f32.gmra.mxu3 %vm418_vm0, %v1731_v2 }
  0x38   : > { %1078 = vmatpush.msrb.mxu3 %v1069_v62 }
  0x39   : > { %1308 = vmatmul.msk.f32.gmra.mxu0 %vm418_vm0, %v1731_v2 }
  0x3a   : > { %1079 = vmatpush.msrb.mxu3 %v1068_v4 }
  0x3c   : > { %1080 = vmatpush.msrb.mxu3 %v1067_v8 }
  0x3e   : > { %1297 = vmatmul.msk.f32.gmra.mxu1 %vm418_vm0, %v1734_v3  ;;  %1301 = vmatmul.msk.f32.gmra.mxu2 %vm418_vm0, %v1734_v3 }
  0x3f   : > { %1305 = vmatmul.msk.f32.gmra.mxu3 %vm418_vm0, %v1734_v3 }
  0x40   : > { %1081 = vmatpush.msrb.mxu3 %v1066_v18 }
  0x41   : > { %1309 = vmatmul.msk.f32.gmra.mxu0 %vm418_vm0, %v1734_v3 }
  0x42   : > { %1082 = vmatpush.msrb.mxu3 %v1065_v22 }
  0x46   : > { %1298 = vmatmul.msk.f32.gmra.mxu1 %vm418_vm0, %v1737_v5  ;;  %1302 = vmatmul.msk.f32.gmra.mxu2 %vm418_vm0, %v1737_v5 }
  0x47   : > { %1306 = vmatmul.msk.f32.gmra.mxu3 %vm418_vm0, %v1737_v5 }
  0x49   : > { %1310 = vmatmul.msk.f32.gmra.mxu0 %vm418_vm0, %v1737_v5 }
  0x4e   : > { %1311 = vmatmul.msk.f32.vlgmr.msra.gmra.mxu1 %vm418_vm0, %v394_v15  ;;  %1315 = vmatmul.msk.f32.vlgmr.msra.gmra.mxu2 %vm418_vm0, %v394_v15 }
  0x4f   : > { %1319 = vmatmul.msk.f32.vlgmr.msra.gmra.mxu3 %vm418_vm0, %v394_v15 }
  0x51   : > { %1323 = vmatmul.msk.f32.vlgmr.msra.gmra.mxu0 %vm418_vm0, %v394_v15 }
  0x56   : > { %1312 = vmatmul.msk.f32.gmra.mxu1 %vm418_vm0, %v1731_v2  ;;  %1316 = vmatmul.msk.f32.gmra.mxu2 %vm418_vm0, %v1731_v2 }
  0x57   : > { %1320 = vmatmul.msk.f32.gmra.mxu3 %vm418_vm0, %v1731_v2 }
  0x59   : > { %1324 = vmatmul.msk.f32.gmra.mxu0 %vm418_vm0, %v1731_v2 }
  0x5e   : > { %1313 = vmatmul.msk.f32.gmra.mxu1 %vm418_vm0, %v1734_v3  ;;  %1317 = vmatmul.msk.f32.gmra.mxu2 %vm418_vm0, %v1734_v3 }
  0x5f   : > { %1321 = vmatmul.msk.f32.gmra.mxu3 %vm418_vm0, %v1734_v3 }
  0x61   : > { %1325 = vmatmul.msk.f32.gmra.mxu0 %vm418_vm0, %v1734_v3 }
  0x66   : > { %1314 = vmatmul.msk.f32.gmra.mxu1 %vm418_vm0, %v1737_v5  ;;  %1318 = vmatmul.msk.f32.gmra.mxu2 %vm418_vm0, %v1737_v5 }
  0x67   : > { %1322 = vmatmul.msk.f32.gmra.mxu3 %vm418_vm0, %v1737_v5 }
  0x69   : > { %1326 = vmatmul.msk.f32.gmra.mxu0 %vm418_vm0, %v1737_v5 }
  0x6e   : > { %1327 = vmatmul.msk.f32.vlgmr.msrb.gmra.mxu1 %vm418_vm0, %v394_v15  ;;  %1339 = vmatmul.msk.f32.vlgmr.msrb.gmra.mxu2 %vm418_vm0, %v390_v26 }
  0x76   : > { %1328 = vmatmul.msk.f32.gmra.mxu1 %vm418_vm0, %v1731_v2  ;;  %1340 = vmatmul.msk.f32.gmra.mxu2 %vm418_vm0, %v391_v27 }
  0x7e   : > { %1329 = vmatmul.msk.f32.gmra.mxu1 %vm418_vm0, %v1734_v3  ;;  %1341 = vmatmul.msk.f32.gmra.mxu2 %vm418_vm0, %v392_v28  ;;  %v1064_v28 = vld [vmem:[%s2183_s4 + $0x40] sm:$0xff] }
  0x7f   : > { %1083 = vmatpush.msrb.mxu3 %v1064_v28 }
  0x86   : > { %1330 = vmatmul.msk.f32.gmra.mxu1 %vm418_vm0, %v1737_v5  ;;  %1342 = vmatmul.msk.f32.gmra.mxu2 %vm418_vm0, %v393_v29 }
  0xa3   : > { %v1825_v30 = vpop.f32.mrf.mxu1 }
  0xa4   : > { %v722_v40 = vand.u32 2147483647, %v1825_v30 }
  0xa6   : > { %v448_v32 = vpop.f32.mrf.mxu0 }
  0xa7   : > { %v721_v33 = vand.u32 2147483647, %v448_v32 }
  0xa9   : > { %v1827_v31 = vpop.f32.mrf.mxu2 }
  0xaa   : > { %v1829_v34 = vpop.f32.mrf.mxu3  ;;  %v723_v2 = vand.u32 2147483647, %v1827_v31 }
  0xab   : > { %v477_v35 = vpop.f32.mrf.mxu1  ;;  %v724_v10 = vand.u32 2147483647, %v1829_v34 }
  0xac   : > { %v725_v36 = vand.u32 2147483647, %v477_v35 }
  0xae   : > { %vm1831_vm1 = vcmp.gt.f32.partialorder %v725_v36, %v721_v33  ;;  %v564_v42 = vpop.f32.mrf.mxu0 }
  0xaf   : > { %v737_v39 = vsel %vm1831_vm1, %v725_v36, %v721_v33  ;;  %v733_v53 = vsel %vm1831_vm1, %v477_v35, %v448_v32  ;;  %v773_v59 = vand.u32 2147483647, %v564_v42  ;;  %v1063_v33 = vld [vmem:[%s2183_s4 + $0x38] sm:$0xff] }
  0xb0   : > { %1084 = vmatpush.msrb.mxu3 %v1063_v33 }
  0xb1   : > { %v506_v38 = vpop.f32.mrf.mxu2 }
  0xb2   : > { %v741_v41 = vand.u32 2147483647, %v506_v38  ;;  %v535_v44 = vpop.f32.mrf.mxu3 }
  0xb3   : > { %v480_v43 = vpop.f32.mrf.mxu1  ;;  %v757_v48 = vand.u32 2147483647, %v535_v44 }
  0xb4   : > { %vm1838_vm2 = vcmp.gt.f32.partialorder %v741_v41, %v737_v39  ;;  %v726_v46 = vand.u32 2147483647, %v480_v43 }
  0xb5   : > { %v753_v49 = vsel %vm1838_vm2, %v741_v41, %v737_v39  ;;  %v749_v63 = vsel %vm1838_vm2, %v506_v38, %v733_v53  ;;  %v1062_v41 = vld [vmem:[%s2183_s4 + $0x30] sm:$0xff]  ;;  %v1059_v53 = vld [vmem:[%s2183_s4 + $0x18] sm:$0xff] }
  0xb6   : > { %vm1842_vm3 = vcmp.gt.f32.partialorder %v726_v46, %v722_v40  ;;  %vm1855_vm4 = vcmp.gt.f32.partialorder %v757_v48, %v753_v49  ;;  %v567_v1 = vpop.f32.mrf.mxu0  ;;  %1085 = vmatpush.msrb.mxu3 %v1062_v41 }
  0xb7   : > { %v738_v52 = vsel %vm1842_vm3, %v726_v46, %v722_v40  ;;  %v769_v0 = vsel %vm1855_vm4, %v757_v48, %v753_v49  ;;  %v765_v6 = vsel %vm1855_vm4, %v535_v44, %v749_v63  ;;  %v734_v11 = vsel %vm1842_vm3, %v480_v43, %v1825_v30 }
  0xb8   : > { %vm777_vm6 = vcmp.gt.f32.partialorder %v773_v59, %v769_v0  ;;  %v774_v19 = vand.u32 2147483647, %v567_v1  ;;  %1086 = vmatpush.msrb.mxu3 %v1061_v45  ;;  %v1125_v45 = vld [vmem:[#allocation5 + $0x60] sm:$0xff] }
  0xb9   : > { %v509_v51 = vpop.f32.mrf.mxu2  ;;  %v781_v14 = vsel %vm777_vm6, %v564_v42, %v765_v6 }
  0xba   : > { %v742_v55 = vand.u32 2147483647, %v509_v51  ;;  %v538_v57 = vpop.f32.mrf.mxu3  ;;  %v1331_v25 = vmul.f32 -1.442695, %v781_v14 }
  0xbb   : > { %v1859_v56 = vpop.f32.mrf.mxu1  ;;  %v758_v3 = vand.u32 2147483647, %v538_v57 }
  0xbc   : > { %vm1864_vm5 = vcmp.gt.f32.partialorder %v742_v55, %v738_v52  ;;  %v727_v61 = vand.u32 2147483647, %v1859_v56  ;;  %1424 = vpow2.f32 %v1331_v25  ;;  %v2003_v25 = vld [vmem:[%s2182_s3] ss:$0 sm:$0xff] }
  0xbd   : > { %v754_v5 = vsel %vm1864_vm5, %v742_v55, %v738_v52  ;;  %v750_v23 = vsel %vm1864_vm5, %v509_v51, %v734_v11 }
  0xbe   : > { %vm1884_vm7 = vcmp.gt.f32.partialorder %v727_v61, %v723_v2  ;;  %vm1895_vm8 = vcmp.gt.f32.partialorder %v758_v3, %v754_v5  ;;  %v570_v30 = vpop.f32.mrf.mxu0 }
  0xbf   : > { %v739_v15 = vsel %vm1884_vm7, %v727_v61, %v723_v2  ;;  %v770_v24 = vsel %vm1895_vm8, %v758_v3, %v754_v5  ;;  %v766_v32 = vsel %vm1895_vm8, %v538_v57, %v750_v23  ;;  %v735_v42 = vsel %vm1884_vm7, %v1859_v56, %v1827_v31  ;;  %v1060_v31 = vld [vmem:[%s2183_s4 + $0x20] sm:$0xff]  ;;  %v1058_v61 = vld [vmem:[%s2183_s4 + $0x10] sm:$0xff] }
  0xc0   : > { %vm778_vm11 = vcmp.gt.f32.partialorder %v774_v19, %v770_v24  ;;  %v775_v43 = vand.u32 2147483647, %v570_v30  ;;  %1087 = vmatpush.msrb.mxu3 %v1060_v31  ;;  %v1056_v3 = vld [vmem:[%s2183_s4] sm:$0xff] }
  0xc1   : > { %v512_v9 = vpop.f32.mrf.mxu2  ;;  %v782_v39 = vsel %vm778_vm11, %v567_v1, %v766_v32  ;;  %v1057_v1 = vld [vmem:[%s2183_s4 + $0x8] sm:$0xff] }
  0xc2   : > { %v743_v13 = vand.u32 2147483647, %v512_v9  ;;  %v541_v17 = vpop.f32.mrf.mxu3  ;;  %v1332_v48 = vmul.f32 -1.442695, %v782_v39  ;;  %v1425_v51 = vpop.eup %1424  ;;  %1088 = vmatpush.msrb.mxu3 %v1059_v53  ;;  %v1123_v53 = vld [vmem:[#allocation5 + $0x50] sm:$0xff] }
  0xc3   : > { %v486_v16 = vpop.f32.mrf.mxu1  ;;  %v759_v27 = vand.u32 2147483647, %v541_v17  ;;  %v797_v57 = vadd.f32 1.0, %v1425_v51 }
  0xc4   : > { %vm1904_vm9 = vcmp.gt.f32.partialorder %v743_v13, %v739_v15  ;;  %v728_v21 = vand.u32 2147483647, %v486_v16  ;;  %1426 = vpow2.f32 %v1332_v48  ;;  %1089 = vmatpush.msrb.mxu3 %v1058_v61 }
  0xc5   : > { %v755_v29 = vsel %vm1904_vm9, %v743_v13, %v739_v15  ;;  %v751_v46 = vsel %vm1904_vm9, %v512_v9, %v735_v42  ;;  %1428 = vrcp.f32 %v797_v57  ;;  %v812_v23 = vand.u32 2147483648, %v797_v57  ;;  %v1126_v42 = vld [vmem:[#allocation5 + $0x68] sm:$0xff] }
  0xc6   : > { %vm1915_vm10 = vcmp.gt.f32.partialorder %v728_v21, %v724_v10  ;;  %vm1931_vm12 = vcmp.gt.f32.partialorder %v759_v27, %v755_v29  ;;  %v573_v54 = vpop.f32.mrf.mxu0  ;;  %1090 = vmatpush.msrb.mxu3 %v1057_v1  ;;  %vm806_vm2 = vweird.f32 %v797_v57  ;;  %v810_v24 = vand.u32 2147483647, %v797_v57 }
  0xc7   : > { %v740_v36 = vsel %vm1915_vm10, %v728_v21, %v724_v10  ;;  %v771_v47 = vsel %vm1931_vm12, %v759_v27, %v755_v29  ;;  %v767_v52 = vsel %vm1931_vm12, %v541_v17, %v751_v46  ;;  %v736_v59 = vsel %vm1915_vm10, %v486_v16, %v1829_v34 }
  0xc8   : > { %vm779_vm14 = vcmp.gt.f32.partialorder %v775_v43, %v771_v47  ;;  %v776_v60 = vand.u32 2147483647, %v573_v54  ;;  %1091 = vmatpush.msrb.mxu3 %v1056_v3  ;;  %v813_v29 = vor.u32 1.1754944e-38, %v812_v23  ;;  %vm811_vm4 = vcmp.eq.f32.partialorder %v810_v24, 8.507059e+37 }
  0xc9   : > { %v515_v35 = vpop.f32.mrf.mxu2  ;;  %v783_v58 = vsel %vm779_vm14, %v570_v30, %v767_v52 }
  0xca   : > { %v744_v38 = vand.u32 2147483647, %v515_v35  ;;  %v544_v40 = vpop.f32.mrf.mxu3  ;;  %v1333_v0 = vmul.f32 -1.442695, %v783_v58  ;;  %v1427_v34 = vpop.eup %1426 }
  0xcb   : > { %v760_v49 = vand.u32 2147483647, %v544_v40  ;;  %v798_v5 = vadd.f32 1.0, %v1427_v34  ;;  %v1429_v7 = vpop.eup %1428 }
  0xcc   : > { %vm1942_vm13 = vcmp.gt.f32.partialorder %v744_v38, %v740_v36  ;;  %1430 = vpow2.f32 %v1333_v0  ;;  %v802_v10 = vmul.f32 %v1429_v7, %v797_v57  ;;  %vm807_vm1 = vweird.f32 %v1429_v7 }
  0xcd   : > { %v756_v50 = vsel %vm1942_vm13, %v744_v38, %v740_v36  ;;  %v752_v62 = vsel %vm1942_vm13, %v515_v35, %v736_v59  ;;  %1432 = vrcp.f32 %v798_v5  ;;  %vm808_vm3 = vmor %vm806_vm2, %vm807_vm1  ;;  %v1128_v35 = vld [vmem:[#allocation5 + $0x78] sm:$0xff]  ;;  %v1127_v36 = vld [vmem:[#allocation5 + $0x70] sm:$0xff]  ;;  %v827_v41 = vand.u32 2147483648, %v798_v5 }
  0xce   : > { %vm1965_vm15 = vcmp.gt.f32.partialorder %v760_v49, %v756_v50  ;;  %v803_v13 = vsub.f32 1.0, %v802_v10  ;;  %1133 = vmatpush.msrb.mxu0 %v1128_v35  ;;  %vm821_vm6 = vweird.f32 %v798_v5  ;;  %v825_v44 = vand.u32 2147483647, %v798_v5  ;;  %v1122_v59 = vld [vmem:[#allocation5 + $0x48] sm:$0xff] }
  0xcf   : > { %v772_v63 = vsel %vm1965_vm15, %v760_v49, %v756_v50  ;;  %v768_v2 = vsel %vm1965_vm15, %v544_v40, %v752_v62  ;;  %v828_v31 = vor.u32 1.1754944e-38, %v827_v41  ;;  %v1124_v50 = vld [vmem:[#allocation5 + $0x58] sm:$0xff]  ;;  %v1121_v62 = vld [vmem:[#allocation5 + $0x40] sm:$0xff]  ;;  %v1118_v10 = vld [vmem:[#allocation5 + $0x28] sm:$0xff] }
  0xd0   : > { %vm780_vm0 = vcmp.gt.f32.partialorder %v776_v60, %v772_v63  ;;  %v804_v16 = vmul.f32 %v1429_v7, %v803_v13  ;;  %1134 = vmatpush.msrb.mxu0 %v1127_v36  ;;  %vm826_vm8 = vcmp.eq.f32.partialorder %v825_v44, 8.507059e+37 }
  0xd1   : > { %v1963_v55 = vpop.f32.mrf.mxu2  ;;  %v784_v6 = vsel %vm780_vm0, %v573_v54, %v768_v2  ;;  %v1120_v2 = vld [vmem:[#allocation5 + $0x38] sm:$0xff] }
  0xd2   : > { %v1334_v8 = vmul.f32 -1.442695, %v784_v6  ;;  %v1431_v9 = vpop.eup %1430  ;;  %v805_v20 = vadd.f32 %v1429_v7, %v804_v16  ;;  %1135 = vmatpush.msrb.mxu0 %v1126_v42  ;;  %v1119_v6 = vld [vmem:[#allocation5 + $0x30] sm:$0xff] }
  0xd3   : > { %v1991_v12 = vadd.f32 1.0, %v1431_v9  ;;  %v1433_v14 = vpop.eup %1432 }
  0xd4   : > { %1434 = vpow2.f32 %v1334_v8  ;;  %v817_v17 = vmul.f32 %v1433_v14, %v798_v5  ;;  %v809_v26 = vsel %vm808_vm3, %v1429_v7, %v805_v20  ;;  %vm822_vm5 = vweird.f32 %v1433_v14  ;;  %1136 = vmatpush.msrb.mxu0 %v1125_v45  ;;  %v1116_v20 = vld [vmem:[#allocation5 + $0x18] sm:$0xff] }
  0xd5   : > { %1436 = vrcp.f32 %v1991_v12  ;;  %v814_v33 = vsel %vm811_vm4, %v813_v29, %v809_v26  ;;  %vm823_vm7 = vmor %vm821_vm6, %vm822_vm5  ;;  %v842_v58 = vand.u32 2147483648, %v1991_v12  ;;  %vm836_vm10 = vweird.f32 %v1991_v12 }
  0xd6   : > { %v818_v21 = vsub.f32 1.0, %v817_v17  ;;  %1137 = vmatpush.msrb.mxu0 %v1124_v50  ;;  %v840_v61 = vand.u32 2147483647, %v1991_v12 }
  0xd7   : > { %v843_v34 = vor.u32 1.1754944e-38, %v842_v58 }
  0xd8   : > { %v819_v27 = vmul.f32 %v1433_v14, %v818_v21  ;;  %1138 = vmatpush.msrb.mxu0 %v1123_v53  ;;  %vm841_vm12 = vcmp.eq.f32.partialorder %v840_v61, 8.507059e+37 }
  0xd9   : > { %v1987_v4 = vpop.f32.mrf.mxu2 }
  0xda   : > { %v1435_v15 = vpop.eup %1434  ;;  %v820_v38 = vadd.f32 %v1433_v14, %v819_v27  ;;  %1139 = vmatpush.msrb.mxu0 %v1122_v59 }
  0xdb   : > { %v1996_v19 = vadd.f32 1.0, %v1435_v15  ;;  %v1998_v22 = vpop.eup %1436 }
  0xdc   : > { %v832_v28 = vmul.f32 %v1998_v22, %v1991_v12  ;;  %v824_v46 = vsel %vm823_vm7, %v1433_v14, %v820_v38  ;;  %vm837_vm9 = vweird.f32 %v1998_v22  ;;  %1140 = vmatpush.msrb.mxu0 %v1121_v62  ;;  %v1117_v14 = vld [vmem:[#allocation5 + $0x20] sm:$0xff] }
  0xdd   : > { %1438 = vrcp.f32 %v1996_v19  ;;  %v829_v52 = vsel %vm826_vm8, %v828_v31, %v824_v46  ;;  %vm838_vm11 = vmor %vm836_vm10, %vm837_vm9  ;;  %v857_v9 = vand.u32 2147483648, %v1996_v19  ;;  %vm851_vm14 = vweird.f32 %v1996_v19 }
  0xde   : > { %v833_v39 = vsub.f32 1.0, %v832_v28  ;;  %1141 = vmatpush.msrb.mxu0 %v1120_v2  ;;  %v855_v13 = vand.u32 2147483647, %v1996_v19  ;;  %v651_v28 = vpop.f32.mrf.mxu3 }
  0xdf   : > { %v858_v17 = vor.u32 1.1754944e-38, %v857_v9  ;;  %v881_v35 = vand.u32 2147483647, %v651_v28 }
  0xe0   : > { %v834_v47 = vmul.f32 %v1998_v22, %v833_v39  ;;  %1142 = vmatpush.msrb.mxu0 %v1119_v6  ;;  %vm856_vm0 = vcmp.eq.f32.partialorder %v855_v13, 8.507059e+37 }
  0xe1   : > { %v1989_v11 = vpop.f32.mrf.mxu2 }
  0xe2   : > { %v835_v56 = vadd.f32 %v1998_v22, %v834_v47  ;;  %1143 = vmatpush.msrb.mxu0 %v1118_v10  ;;  %v867_v31 = vand.u32 2147483647, %v1989_v11 }
  0xe3   : > { %v2009_v40 = vpop.eup %1438 }
  0xe4   : > { %v847_v48 = vmul.f32 %v2009_v40, %v1996_v19  ;;  %v839_v63 = vsel %vm838_vm11, %v1998_v22, %v835_v56  ;;  %vm852_vm13 = vweird.f32 %v2009_v40  ;;  %1144 = vmatpush.msrb.mxu0 %v1117_v14  ;;  %v593_v19 = vpop.f32.mrf.mxu1 }
  0xe5   : > { %v844_v5 = vsel %vm841_vm12, %v843_v34, %v839_v63  ;;  %vm853_vm15 = vmor %vm851_vm14, %vm852_vm13 }
  0xe6   : > { %v848_v57 = vsub.f32 1.0, %v847_v48  ;;  %1145 = vmatpush.msrb.mxu0 %v1116_v20 }
  0xe8   : > { %v849_v0 = vmul.f32 %v2009_v40, %v848_v57 }
  0xe9   : > { %v1994_v18 = vpop.f32.mrf.mxu2 }
  0xea   : > { %v850_v8 = vadd.f32 %v2009_v40, %v849_v0  ;;  %v868_v2 = vand.u32 2147483647, %v1994_v18 }
  0xec   : > { %v854_v15 = vsel %vm853_vm15, %v2009_v40, %v850_v8  ;;  %v596_v26 = vpop.f32.mrf.mxu1  ;;  %v866_v40 = vand.u32 2147483647, %v1987_v4 }
  0xed   : > { %v859_v22 = vsel %vm856_vm0, %v858_v17, %v854_v15  ;;  %v862_v39 = vand.u32 2147483647, %v596_v26 }
  0xef   : > { %vm2042_vm3 = vcmp.gt.f32.partialorder %v866_v40, %v862_v39 }
  0xf0   : > { %v878_v47 = vsel %vm2042_vm3, %v866_v40, %v862_v39  ;;  %v874_v61 = vsel %vm2042_vm3, %v1987_v4, %v596_v26  ;;  %v1115_v39 = vld [vmem:[#allocation5 + $0x10] sm:$0xff] }
  0xf1   : > { %v1036_v30 = vpop.f32.mrf.mxu2  ;;  %1146 = vmatpush.msrb.mxu0 %v1115_v39 }
  0xf2   : > { %v1037_v32 = vadd.f32 %v2003_v25, %v1036_v30  ;;  %v861_v30 = vand.u32 2147483647, %v593_v19 }
  0xf4   : > { %v1048_v37 = vmul.f32 %v1037_v32, %v814_v33  ;;  %v2030_v27 = vpop.f32.mrf.mxu1  ;;  %v865_v32 = vand.u32 2147483647, %v1963_v55  ;;  %v680_v33 = vpop.f32.mrf.mxu0 }
  0xf5   : > { %v897_v41 = vand.u32 2147483647, %v680_v33 }
  0xf6   : > { %v1052_v43 = vmax.f32 %v1048_v37, 0.0  ;;  %vm2035_vm1 = vcmp.gt.f32.partialorder %v865_v32, %v861_v30  ;;  %v654_v37 = vpop.f32.mrf.mxu3 }
  0xf7   : > { %v877_v36 = vsel %vm2035_vm1, %v865_v32, %v861_v30  ;;  %v882_v45 = vand.u32 2147483647, %v654_v37  ;;  %v873_v46 = vsel %vm2035_vm1, %v1963_v55, %v593_v19 }
  0xf8   : > { %1092 = vmatmul.f32.vlgmr.msrb.gmra.mxu3 %v1052_v43  ;;  %vm885_vm2 = vcmp.gt.f32.partialorder %v881_v35, %v877_v36 }
  0xf9   : > { %v1039_v49 = vpop.f32.mrf.mxu2  ;;  %v893_v43 = vsel %vm885_vm2, %v881_v35, %v877_v36  ;;  %vm2057_vm5 = vcmp.gt.f32.partialorder %v882_v45, %v878_v47 }
  0xfa   : > { %v1040_v51 = vadd.f32 %v2003_v25, %v1039_v49  ;;  %vm2051_vm4 = vcmp.gt.f32.partialorder %v897_v41, %v893_v43  ;;  %v863_v49 = vand.u32 2147483647, %v2030_v27  ;;  %v894_v58 = vsel %vm2057_vm5, %v882_v45, %v878_v47 }
  0xfb   : > { %v909_v55 = vsel %vm2051_vm4, %v897_v41, %v893_v43  ;;  %v890_v4 = vsel %vm2057_vm5, %v654_v37, %v874_v61  ;;  %v1114_v41 = vld [vmem:[#allocation5 + $0x8] sm:$0xff] }
  0xfc   : > { %v1049_v54 = vmul.f32 %v1040_v51, %v829_v52  ;;  %v2032_v29 = vpop.f32.mrf.mxu1  ;;  %v683_v44 = vpop.f32.mrf.mxu0  ;;  %vm2063_vm6 = vcmp.gt.f32.partialorder %v867_v31, %v863_v49  ;;  %1147 = vmatpush.msrb.mxu0 %v1114_v41 }
  0xfd   : > { %v898_v56 = vand.u32 2147483647, %v683_v44  ;;  %v879_v62 = vsel %vm2063_vm6, %v867_v31, %v863_v49  ;;  %v864_v34 = vand.u32 2147483647, %v2032_v29  ;;  %v875_v20 = vsel %vm2063_vm6, %v1989_v11, %v2030_v27 }
  0xfe   : > { %v1053_v60 = vmax.f32 %v1049_v54, 0.0  ;;  %v657_v51 = vpop.f32.mrf.mxu3  ;;  %v889_v54 = vsel %vm885_vm2, %v651_v28, %v873_v46 }
  0xff   : > { %v905_v59 = vsel %vm2051_vm4, %v680_v33, %v889_v54  ;;  %vm2076_vm8 = vcmp.gt.f32.partialorder %v898_v56, %v894_v58  ;;  %vm2090_vm10 = vcmp.gt.f32.partialorder %v868_v2, %v864_v34 }
 0x100   : > { %1095 = vmatmul.f32.gmra.mxu3 %v1053_v60  ;;  %v883_v60 = vand.u32 2147483647, %v657_v51  ;;  %v910_v8 = vsel %vm2076_vm8, %v898_v56, %v894_v58  ;;  %v906_v14 = vsel %vm2076_vm8, %v683_v44, %v890_v4  ;;  %v876_v36 = vsel %vm2090_vm10, %v1994_v18, %v2032_v29  ;;  %v1113_v44 = vld [vmem:[#allocation5] sm:$0xff] }
 0x101   : > { %v1042_v1 = vpop.f32.mrf.mxu2  ;;  %1148 = vmatpush.msrb.mxu0 %v1113_v44 }
 0x102   : > { %v1043_v3 = vadd.f32 %v2003_v25, %v1042_v1  ;;  %vm2082_vm9 = vcmp.gt.f32.partialorder %v883_v60, %v879_v62 }
 0x103   : > { %v895_v13 = vsel %vm2082_vm9, %v883_v60, %v879_v62  ;;  %v891_v26 = vsel %vm2082_vm9, %v657_v51, %v875_v20  ;;  %v1422_v62 = vld [vmem:[%s2184_s5] ss:$0 sm:$0xff] }
 0x104   : > { %v1050_v7 = vmul.f32 %v1043_v3, %v844_v5  ;;  %v709_v38 = vpop.f32.mrf.mxu1  ;;  %v686_v63 = vpop.f32.mrf.mxu0 }
 0x105   : > { %v913_v50 = vand.u32 2147483647, %v709_v38  ;;  %v899_v10 = vand.u32 2147483647, %v686_v63 }
 0x106   : > { %v1054_v12 = vmax.f32 %v1050_v7, 0.0  ;;  %v660_v7 = vpop.f32.mrf.mxu3 }
 0x107   : > { %vm917_vm7 = vcmp.gt.f32.partialorder %v913_v50, %v909_v55  ;;  %v884_v15 = vand.u32 2147483647, %v660_v7  ;;  %vm2104_vm12 = vcmp.gt.f32.partialorder %v899_v10, %v895_v13 }
 0x108   : > { %1098 = vmatmul.f32.gmra.mxu3 %v1054_v12  ;;  %v921_v0 = vsel %vm917_vm7, %v709_v38, %v905_v59  ;;  %v911_v28 = vsel %vm2104_vm12, %v899_v10, %v895_v13  ;;  %v907_v33 = vsel %vm2104_vm12, %v686_v63, %v891_v26 }
 0x109   : > { %v1045_v16 = vpop.f32.mrf.mxu2  ;;  %v1335_v6 = vmul.f32 -1.442695, %v921_v0 }
 0x10a   : > { %v1046_v21 = vadd.f32 %v2003_v25, %v1045_v16  ;;  %v880_v16 = vsel %vm2090_vm10, %v868_v2, %v864_v34 }
 0x10b   : > { %1440 = vpow2.f32 %v1335_v6  ;;  %vm2108_vm13 = vcmp.gt.f32.partialorder %v884_v15, %v880_v16 }
 0x10c   : > { %v1051_v23 = vmul.f32 %v1046_v21, %v859_v22  ;;  %v712_v52 = vpop.f32.mrf.mxu1  ;;  %v896_v11 = vsel %vm2108_vm13, %v884_v15, %v880_v16  ;;  %v892_v42 = vsel %vm2108_vm13, %v660_v7, %v876_v36 }
 0x10d   : > { %v914_v3 = vand.u32 2147483647, %v712_v52 }
 0x10e   : > { %v1055_v24 = vmax.f32 %v1051_v23, 0.0  ;;  %v689_v23 = vpop.f32.mrf.mxu0 }
 0x10f   : > { %vm918_vm11 = vcmp.gt.f32.partialorder %v914_v3, %v910_v8  ;;  %v900_v32 = vand.u32 2147483647, %v689_v23 }
 0x110   : > { %1101 = vmatmul.f32.gmra.mxu3 %v1055_v24  ;;  %v922_v17 = vsel %vm918_vm11, %v712_v52, %v906_v14 }
 0x111   : > { %v1336_v19 = vmul.f32 -1.442695, %v922_v17  ;;  %v1441_v30 = vpop.eup %1440  ;;  %vm2124_vm15 = vcmp.gt.f32.partialorder %v900_v32, %v896_v11 }
 0x112   : > { %v937_v25 = vadd.f32 1.0, %v1441_v30  ;;  %v912_v43 = vsel %vm2124_vm15, %v900_v32, %v896_v11  ;;  %v908_v18 = vsel %vm2124_vm15, %v689_v23, %v892_v42 }
 0x113   : > { %1442 = vpow2.f32 %v1336_v19 }
 0x114   : > { %v715_v9 = vpop.f32.mrf.mxu1  ;;  %1444 = vrcp.f32 %v937_v25  ;;  %v952_v60 = vand.u32 2147483648, %v937_v25  ;;  %vm946_vm2 = vweird.f32 %v937_v25  ;;  %v950_v61 = vand.u32 2147483647, %v937_v25 }
 0x115   : > { %v915_v22 = vand.u32 2147483647, %v715_v9 }
 0x116   : > { %v953_v34 = vor.u32 1.1754944e-38, %v952_v60  ;;  %vm951_vm4 = vcmp.eq.f32.partialorder %v950_v61, 8.507059e+37 }
 0x117   : > { %vm919_vm14 = vcmp.gt.f32.partialorder %v915_v22, %v911_v28 }
 0x118   : > { %v923_v35 = vsel %vm919_vm14, %v715_v9, %v907_v33 }
 0x119   : > { %v1337_v40 = vmul.f32 -1.442695, %v923_v35  ;;  %v1443_v45 = vpop.eup %1442 }
 0x11a   : > { %v938_v29 = vadd.f32 1.0, %v1443_v45  ;;  %v1445_v47 = vpop.eup %1444 }
 0x11b   : > { %1446 = vpow2.f32 %v1337_v40  ;;  %v942_v31 = vmul.f32 %v1445_v47, %v937_v25  ;;  %vm947_vm1 = vweird.f32 %v1445_v47 }
 0x11c   : > { %v718_v27 = vpop.f32.mrf.mxu1  ;;  %1448 = vrcp.f32 %v938_v29  ;;  %vm948_vm3 = vmor %vm946_vm2, %vm947_vm1  ;;  %v967_v9 = vand.u32 2147483648, %v938_v29  ;;  %vm961_vm6 = vweird.f32 %v938_v29  ;;  %v965_v12 = vand.u32 2147483647, %v938_v29 }
 0x11d   : > { %v916_v38 = vand.u32 2147483647, %v718_v27  ;;  %v943_v51 = vsub.f32 1.0, %v942_v31 }
 0x11e   : > { %v968_v17 = vor.u32 1.1754944e-38, %v967_v9  ;;  %vm966_vm8 = vcmp.eq.f32.partialorder %v965_v12, 8.507059e+37 }
 0x11f   : > { %vm920_vm0 = vcmp.gt.f32.partialorder %v916_v38, %v912_v43  ;;  %v944_v54 = vmul.f32 %v1445_v47, %v943_v51 }
 0x120   : > { %v924_v46 = vsel %vm920_vm0, %v718_v27, %v908_v18 }
 0x121   : > { %v1338_v48 = vmul.f32 -1.442695, %v924_v46  ;;  %v1447_v49 = vpop.eup %1446  ;;  %v945_v57 = vadd.f32 %v1445_v47, %v944_v54 }
 0x122   : > { %v939_v50 = vadd.f32 1.0, %v1447_v49  ;;  %v1449_v52 = vpop.eup %1448 }
 0x123   : > { %1450 = vpow2.f32 %v1338_v48  ;;  %v957_v55 = vmul.f32 %v1449_v52, %v938_v29  ;;  %v949_v63 = vsel %vm948_vm3, %v1445_v47, %v945_v57  ;;  %vm962_vm5 = vweird.f32 %v1449_v52  ;;  %v1423_v29 = vld [vmem:[%s2187_s8] ss:$0 sm:$0xff] }
 0x124   : > { %1452 = vrcp.f32 %v939_v50  ;;  %v954_v5 = vsel %vm951_vm4, %v953_v34, %v949_v63  ;;  %vm963_vm7 = vmor %vm961_vm6, %vm962_vm5  ;;  %v982_v19 = vand.u32 2147483648, %v939_v50  ;;  %vm976_vm10 = vweird.f32 %v939_v50 }
 0x125   : > { %v958_v58 = vsub.f32 1.0, %v957_v55  ;;  %v980_v28 = vand.u32 2147483647, %v939_v50 }
 0x126   : > { %v983_v27 = vor.u32 1.1754944e-38, %v982_v19 }
 0x127   : > { %v959_v0 = vmul.f32 %v1449_v52, %v958_v58  ;;  %vm981_vm12 = vcmp.eq.f32.partialorder %v980_v28, 8.507059e+37 }
 0x129   : > { %v1451_v53 = vpop.eup %1450  ;;  %v960_v4 = vadd.f32 %v1449_v52, %v959_v0 }
 0x12a   : > { %v2134_v56 = vadd.f32 1.0, %v1451_v53  ;;  %v1453_v59 = vpop.eup %1452 }
 0x12b   : > { %v972_v1 = vmul.f32 %v1453_v59, %v939_v50  ;;  %v964_v13 = vsel %vm963_vm7, %v1449_v52, %v960_v4  ;;  %vm977_vm9 = vweird.f32 %v1453_v59 }
 0x12c   : > { %1454 = vrcp.f32 %v2134_v56  ;;  %v969_v21 = vsel %vm966_vm8, %v968_v17, %v964_v13  ;;  %vm978_vm11 = vmor %vm976_vm10, %vm977_vm9  ;;  %v997_v37 = vand.u32 2147483648, %v2134_v56  ;;  %vm991_vm14 = vweird.f32 %v2134_v56 }
 0x12d   : > { %v973_v7 = vsub.f32 1.0, %v972_v1  ;;  %v995_v39 = vand.u32 2147483647, %v2134_v56 }
 0x12e   : > { %v998_v42 = vor.u32 1.1754944e-38, %v997_v37 }
 0x12f   : > { %v974_v14 = vmul.f32 %v1453_v59, %v973_v7  ;;  %vm996_vm0 = vcmp.eq.f32.partialorder %v995_v39, 8.507059e+37 }
 0x131   : > { %v975_v23 = vadd.f32 %v1453_v59, %v974_v14 }
 0x132   : > { %v1455_v8 = vpop.eup %1454 }
 0x133   : > { %v987_v15 = vmul.f32 %v1455_v8, %v2134_v56  ;;  %v979_v30 = vsel %vm978_vm11, %v1453_v59, %v975_v23  ;;  %vm992_vm13 = vweird.f32 %v1455_v8 }
 0x134   : > { %v984_v25 = vsel %vm981_vm12, %v983_v27, %v979_v30  ;;  %vm993_vm15 = vmor %vm991_vm14, %vm992_vm13 }
 0x135   : > { %v988_v24 = vsub.f32 1.0, %v987_v15 }
 0x137   : > { %v989_v32 = vmul.f32 %v1455_v8, %v988_v24 }
 0x139   : > { %v990_v36 = vadd.f32 %v1455_v8, %v989_v32 }
 0x13b   : > { %v994_v40 = vsel %vm993_vm15, %v1455_v8, %v990_v36 }
 0x13c   : > { %v999_v44 = vsel %vm996_vm0, %v998_v42, %v994_v40 }
 0x17b   : > { %v1093_v2 = vpop.f32.mrf.mxu3 }
 0x17c   : > { %v1094_v3 = vadd.f32 %v1422_v62, %v1093_v2 }
 0x17e   : > { %v1105_v6 = vmul.f32 %v1094_v3, %v954_v5 }
 0x180   : > { %v1109_v10 = vmax.f32 %v1105_v6, 0.0 }
 0x182   : > { %1149 = vmatmul.f32.vlgmr.msrb.gmra.mxu0 %v1109_v10 }
 0x183   : > { %v1096_v16 = vpop.f32.mrf.mxu3 }
 0x184   : > { %v1097_v20 = vadd.f32 %v1422_v62, %v1096_v16 }
 0x186   : > { %v1106_v22 = vmul.f32 %v1097_v20, %v969_v21 }
 0x188   : > { %v1110_v26 = vmax.f32 %v1106_v22, 0.0 }
 0x18a   : > { %1152 = vmatmul.f32.gmra.mxu0 %v1110_v26 }
 0x18b   : > { %v1099_v11 = vpop.f32.mrf.mxu3 }
 0x18c   : > { %v1100_v33 = vadd.f32 %v1422_v62, %v1099_v11 }
 0x18e   : > { %v1107_v35 = vmul.f32 %v1100_v33, %v984_v25 }
 0x190   : > { %v1111_v38 = vmax.f32 %v1107_v35, 0.0 }
 0x192   : > { %1155 = vmatmul.f32.gmra.mxu0 %v1111_v38 }
 0x193   : > { %v1102_v41 = vpop.f32.mrf.mxu3 }
 0x194   : > { %v1103_v43 = vadd.f32 %v1422_v62, %v1102_v41 }
 0x196   : > { %v1108_v45 = vmul.f32 %v1103_v43, %v999_v44 }
 0x198   : > { %v1112_v18 = vmax.f32 %v1108_v45, 0.0 }
 0x19a   : > { %1158 = vmatmul.f32.gmra.mxu0 %v1112_v18 }
 0x1ff   : > { %v1150_v46 = vpop.f32.mrf.mxu0 }
 0x200   : > { %v1151_v47 = vadd.f32 %v1423_v29, %v1150_v46 }
 0x202   : > { %1162 = vst [vmem:[%s376_s24] sm:$0xff] %v1151_v47 }
 0x207   : > { %v1153_v48 = vpop.f32.mrf.mxu0 }
 0x208   : > { %v1154_v49 = vadd.f32 %v1423_v29, %v1153_v48 }
 0x20a   : > { %1163 = vst [vmem:[%s376_s24 + $0x8] sm:$0xff] %v1154_v49 }
 0x20f   : > { %v1156_v31 = vpop.f32.mrf.mxu0 }
 0x210   : > { %v1157_v50 = vadd.f32 %v1423_v29, %v1156_v31 }
 0x212   : > { %1164 = vst [vmem:[%s376_s24 + $0x10] sm:$0xff] %v1157_v50 }
 0x217   : > { %v1159_v51 = vpop.f32.mrf.mxu0 }
 0x218   : > { %v1160_v52 = vadd.f32 %v1423_v29, %v1159_v51 }
 0x21a   : > { %1165 = vst [vmem:[%s376_s24 + $0x18] sm:$0xff] %v1160_v52 }
 0x21b   : > { %1543 = shalt.err (!%p1540_p8)
}
 0x21c   : > { %s1594_s16 = smov 128   ;;  %s1595_s24 = smov 8  }
 0x21d   : > { %1363 = dma.vmem_to_hbm [thread:$0]  (%p1684_p5), %s1180_s27, 512, %s1182_s28, %s1167_s29, %s1594_s16, %s1594_s16, %s1595_s24  }
 0x21e PF: > { %p1380_p9 = scmp.ge.s32.totalorder %s1586_s12, 2  ;;  %s1196_s25 = sand.u32 1, %s1574_s30  }
 0x21f   : > { %s1197_s26 = scalar_lea.sflag [#allocation4], %s1196_s25 }
 0x220   : > { %p1373_p10 = pnand %p1380_p9, %p1688_p6 }
 0x222   : > { %p1374_p11 = pneg %p1373_p10 }
 0x224   : > { %1569 = dma.done.wait (%p1374_p11), %s1197_s26, 512  }
 0x225   : > { %1571 = vsyncadd (%p1374_p11), %s1197_s26, 4294966784  ;;  %p21_p12 = scmp.ge.s32.totalorder %s1671_s15, 4   ;;  %s2240_s30 = smov %s1578_s10 }
 0x226   : > { %s2241_s10 = smov %s1582_s11  ;;  %s2242_s11 = smov %s1682_s18 }
 0x227   : > { %s2243_s12 = smov %s1671_s15  ;;  %23 = sbr.rel (!%p21_p12) target bundleno = 7 (0x7), region = 103 }
 0x22c   :  { %1203 = vsyncpa [#allocation3], 1 }
 0x22d   :  { %1205 = vsyncpa [#allocation3 + $0x1], 1 }
 0x22e   :  { %1206 = vsyncpa [#allocation6], 1 }
 0x22f   :  { %1207 = vsyncpa [#allocation4], 1 }
 0x230   :  { %1209 = vsyncpa [#allocation4 + $0x1], 1 }

</bundles_post_ra>
